<compile_context>
chip_gen: v7x
topology: tpu7x:2x2x1
jax: 0.10.0
libtpu: 0.0.40
codegen_flags: <defaults>
</compile_context>

<pallas_src>
import jax
import jax.numpy as jnp
from jax import lax
from jax.experimental import pallas as pl
from jax.experimental.pallas import tpu as pltpu


_NEG_BIG = -1e30  # finite "masked" score: avoids inf-inf -> NaN if reused with other masks


def _pick_tile(n, prefer=256):
    """Largest power-of-two tile <= prefer that divides n (falls back to n itself)."""
    c = prefer
    while c >= 8:
        if n % c == 0:
            return c
        c //= 2
    return n


def _vmem_limit_bytes(est):
    # Generous headroom, but never above the smallest physical VMEM (v7x: 64 MiB).
    return int(min(max(2 * int(est), 32 * 1024 * 1024), 64 * 1024 * 1024))


def pack_mha_params(wq, wk, wv, wp, bp, *, param_dtype=None):
    """One-time weight packing (hoist this out of the forward path).

    wq, wk, wv : (H, D, hs)  per-head weights in "x @ W" orientation
    wp         : (D, D)      output projection ("x @ Wp + bp")
    bp         : (D,)

    Returns (wqkv, wp, bp2d) where wqkv is the fused (D, 3*D) QKV weight with the
    d_model**-0.5 attention scale already folded into the Q columns.
    Pass param_dtype=jnp.bfloat16 to feed the MXU at its bf16 peak.
    """
    H, D, hs = wq.shape
    assert H * hs == D

    def cat_heads(w):                              # (H, D, hs) -> (D, H*hs)
        return jnp.transpose(w, (1, 0, 2)).reshape(D, H * hs)

    scale = float(D) ** -0.5                       # reference scales by d_model**-0.5
    wqkv = jnp.concatenate(
        [cat_heads(wq) * scale, cat_heads(wk), cat_heads(wv)], axis=-1)   # (D, 3D)
    bp2d = bp.reshape(1, D)
    if param_dtype is not None:
        wqkv = wqkv.astype(param_dtype)
        wp = wp.astype(param_dtype)
    return wqkv, wp, bp2d


def _mha_forward(x, wqkv, wp, bp2d, num_heads, single_buffer_weights):
    B, T, D = x.shape
    H = num_heads
    HS = D // H
    assert H * HS == D
    assert wqkv.shape == (D, 3 * D) and wp.shape == (D, D) and bp2d.shape == (1, D)

    wbuf = 1 if single_buffer_weights else 2

    def weight_spec(shape):
        # Grid-invariant operands: constant index_map; single-buffer when supported.
        if single_buffer_weights:
            return pl.BlockSpec(shape, lambda *args: (0,) * len(shape),
                                pipeline_mode=pl.Buffered(1))
        return pl.BlockSpec(shape, lambda *args: (0,) * len(shape))

    # ------------------------------------------------------------------
    # Kernel 1: fused QKV projection on a flattened (B*T, D) row view.
    # One (rows, D) @ (D, 3D) matmul per tile; Q scale folded into the weight.
    # ------------------------------------------------------------------
    rows = B * T
    TR = _pick_tile(rows, 256)
    nr = rows // TR
    x2 = x.reshape(rows, D)

    def qkv_kernel(x_ref, w_ref, q_ref, k_ref, v_ref):
        qkv = jnp.dot(x_ref[...], w_ref[...],
                      preferred_element_type=jnp.float32)          # (TR, 3D)
        q_ref[...] = qkv[:, 0 * D:1 * D].astype(q_ref.dtype)       # already scaled
        k_ref[...] = qkv[:, 1 * D:2 * D].astype(k_ref.dtype)
        v_ref[...] = qkv[:, 2 * D:3 * D].astype(v_ref.dtype)

    row_spec = pl.BlockSpec((TR, D), lambda r: (r, 0))
    est_a = (2 * TR * D * x.dtype.itemsize                 # x tile (double-buffered)
             + 2 * 3 * TR * D * x.dtype.itemsize           # q/k/v tiles
             + wbuf * D * 3 * D * wqkv.dtype.itemsize)     # fused weight

    q2, k2, v2 = pl.pallas_call(
        qkv_kernel,
        out_shape=[jax.ShapeDtypeStruct((rows, D), x.dtype)] * 3,
        grid_spec=pltpu.PrefetchScalarGridSpec(
            num_scalar_prefetch=0,
            grid=(nr,),
            in_specs=[row_spec, weight_spec((D, 3 * D))],
            out_specs=[row_spec, row_spec, row_spec],
        ),
        compiler_params=pltpu.CompilerParams(
            dimension_semantics=("parallel",),
            vmem_limit_bytes=_vmem_limit_bytes(est_a)),
    )(x2, wqkv)

    q3 = q2.reshape(B, T, D)
    k3 = k2.reshape(B, T, D)
    v3 = v2.reshape(B, T, D)

    # ------------------------------------------------------------------
    # Kernel 2: flash-style causal attention + fused output projection.
    # grid = (B, q_tiles, kv_tiles); kv is the innermost "arbitrary" reduction axis.
    # ------------------------------------------------------------------
    TQ = _pick_tile(T, 256)
    TKV = _pick_tile(T, 256)
    nq = T // TQ
    nkv = T // TKV

    def attn_kernel(q_ref, k_ref, v_ref, wp_ref, b_ref, o_ref, m_scr, l_scr, acc_scr):
        # q_ref: (1,TQ,D)  k_ref/v_ref: (1,TKV,D)  wp_ref: (D,D)  b_ref: (1,D)
        # m_scr/l_scr: (H,TQ,1) f32 running max/sum   acc_scr: (TQ,D) f32 accumulator
        qi = pl.program_id(1)
        ki = pl.program_id(2)
        q_start = qi * TQ
        k_start = ki * TKV

        @pl.when(ki == 0)
        def _init():
            m_scr[...] = jnp.full(m_scr.shape, _NEG_BIG, dtype=m_scr.dtype)
            l_scr[...] = jnp.zeros(l_scr.shape, dtype=l_scr.dtype)
            acc_scr[...] = jnp.zeros(acc_scr.shape, dtype=acc_scr.dtype)

        # Causal tile skip: KV tiles strictly above the diagonal contribute nothing.
        @pl.when(k_start < q_start + TQ)
        def _compute():
            q = q_ref[0]                                   # (TQ, D)  (scale pre-folded)
            k = k_ref[0]                                   # (TKV, D)
            v = v_ref[0]                                   # (TKV, D)
            rows_g = q_start + lax.broadcasted_iota(jnp.int32, (TQ, TKV), 0)
            cols_g = k_start + lax.broadcasted_iota(jnp.int32, (TQ, TKV), 1)
            causal = cols_g <= rows_g

            for h in range(H):        # static unroll; per-head state lives in scratch
                lo, hi = h * HS, (h + 1) * HS
                # Q_h @ K_h^T without materializing a transpose of K.
                s = lax.dot_general(q[:, lo:hi], k[:, lo:hi],
                                    (((1,), (1,)), ((), ())),
                                    preferred_element_type=jnp.float32)   # (TQ, TKV)
                s = jnp.where(causal, s, _NEG_BIG)

                m_prev = m_scr[h]                                         # (TQ, 1)
                m_new = jnp.maximum(m_prev, jnp.max(s, axis=-1, keepdims=True))
                alpha = jnp.exp(m_prev - m_new)                           # (TQ, 1)
                p = jnp.exp(s - m_new)                                    # (TQ, TKV)
                l_scr[h] = alpha * l_scr[h] + jnp.sum(p, axis=-1, keepdims=True)
                m_scr[h] = m_new
                # attention-weight dropout: identity in eval mode (no-op).
                pv = jnp.dot(p.astype(v.dtype), v[:, lo:hi],
                             preferred_element_type=jnp.float32)          # (TQ, HS)
                acc_scr[:, lo:hi] = alpha * acc_scr[:, lo:hi] + pv

        @pl.when(ki == pl.num_programs(2) - 1)
        def _finalize():
            # Exact per-head softmax normalization (no approx reciprocal), then the
            # fused output projection + bias; one lane-dense (TQ, D) store.
            for h in range(H):
                lo, hi = h * HS, (h + 1) * HS
                acc_scr[:, lo:hi] = acc_scr[:, lo:hi] / l_scr[h]
            y = jnp.dot(acc_scr[...].astype(wp_ref.dtype), wp_ref[...],
                        preferred_element_type=jnp.float32) + b_ref[...]
            # projection dropout: identity in eval mode (no-op).
            o_ref[0] = y.astype(o_ref.dtype)

    q_spec = pl.BlockSpec((1, TQ, D), lambda b, qi, ki: (b, qi, 0))
    kv_spec = pl.BlockSpec((1, TKV, D), lambda b, qi, ki: (b, ki, 0))
    o_spec = pl.BlockSpec((1, TQ, D), lambda b, qi, ki: (b, qi, 0))

    est_b = (2 * 2 * TQ * D * x.dtype.itemsize             # q tile + out tile
             + 2 * 2 * TKV * D * x.dtype.itemsize          # k + v tiles
             + wbuf * (D * D * wp.dtype.itemsize + D * bp2d.dtype.itemsize)
             + (2 * H * TQ * 128 + TQ * D) * 4)            # f32 scratch (m, l, acc)

    out = pl.pallas_call(
        attn_kernel,
        out_shape=jax.ShapeDtypeStruct((B, T, D), x.dtype),
        grid_spec=pltpu.PrefetchScalarGridSpec(
            num_scalar_prefetch=0,
            grid=(B, nq, nkv),
            in_specs=[q_spec, kv_spec, kv_spec,
                      weight_spec((D, D)), weight_spec((1, D))],
            out_specs=o_spec,
            scratch_shapes=[
                pltpu.VMEM((H, TQ, 1), jnp.float32),   # running row max per head
                pltpu.VMEM((H, TQ, 1), jnp.float32),   # running softmax denom per head
                pltpu.VMEM((TQ, D), jnp.float32),      # output accumulator
            ],
        ),
        compiler_params=pltpu.CompilerParams(
            # B and q-tile axes are independent -> both parallel (keeps both v7x
            # TensorCores busy even for B == 1); kv is the reduction axis.
            dimension_semantics=("parallel", "parallel", "arbitrary"),
            vmem_limit_bytes=_vmem_limit_bytes(est_b)),
    )(q3, k3, v3, wp, bp2d)
    return out


def multi_head_attention_packed(x, wqkv, wp, bp2d, num_heads):
    """Forward pass with pre-packed weights (see pack_mha_params). x: (B,T,D) -> (B,T,D)."""
    try:
        return _mha_forward(x, wqkv, wp, bp2d, num_heads, single_buffer_weights=True)
    except Exception:
        # Fallback for jax versions without pipeline_mode=pl.Buffered(1) support:
        # identical kernel, default (double-buffered) weight pipelining.
        return _mha_forward(x, wqkv, wp, bp2d, num_heads, single_buffer_weights=False)


def multi_head_attention(x, wq, wk, wv, wp, bp):
    """Convenience wrapper. For repeated calls, hoist pack_mha_params to init time."""
    H = wq.shape[0]
    wqkv, wp_p, bp_p = pack_mha_params(wq, wk, wv, wp, bp)
    return multi_head_attention_packed(x, wqkv, wp_p, bp_p, H)


# ----------------------------------------------------------------------------
# Pure-JAX reference for the sanity check
# ----------------------------------------------------------------------------
def reference(x, wq, wk, wv, wp, bp):
    B, T, D = x.shape
    H, _, hs = wq.shape
    q = jnp.einsum("btd,hde->bhte", x, wq)
    k = jnp.einsum("btd,hde->bhte", x, wk)
    v = jnp.einsum("btd,hde->bhte", x, wv)
    wei = jnp.einsum("bhte,bhse->bhts", q, k) * (D ** -0.5)
    mask = jnp.tril(jnp.ones((T, T), dtype=bool))
    wei = jnp.where(mask, wei, -jnp.inf)
    wei = jax.nn.softmax(wei, axis=-1)
    out = jnp.einsum("bhts,bhse->bhte", wei, v)
    out = jnp.transpose(out, (0, 2, 1, 3)).reshape(B, T, D)
    return out @ wp + bp


if __name__ == "__main__":
    # Keep both the kernel's and the reference's f32 matmuls at full precision on
    # real TPUs (default TPU f32 matmul precision is bf16-level, which alone can
    # exceed a 1e-3 tolerance).
    jax.config.update("jax_default_matmul_precision", "highest")

    # Small config consistent with the module: d_model=32, num_heads=4 -> head_size=8
    B, T, D, H = 2, 8, 32, 4
    hs = D // H

    key = jax.random.PRNGKey(0)
    kx, kq, kk, kv, kwp, kbp = jax.random.split(key, 6)

    x = jax.random.normal(kx, (B, T, D), dtype=jnp.float32)
    wq = jax.random.normal(kq, (H, D, hs), dtype=jnp.float32) * (D ** -0.5)
    wk = jax.random.normal(kk, (H, D, hs), dtype=jnp.float32) * (D ** -0.5)
    wv = jax.random.normal(kv, (H, D, hs), dtype=jnp.float32) * (D ** -0.5)
    wp = jax.random.normal(kwp, (D, D), dtype=jnp.float32) * (D ** -0.5)
    bp = jax.random.normal(kbp, (D,), dtype=jnp.float32) * 0.01

    # One-time packing, hoisted out of the forward path (perf-review item).
    wqkv, wp_p, bp_p = pack_mha_params(wq, wk, wv, wp, bp)

    out = multi_head_attention_packed(x, wqkv, wp_p, bp_p, H)
    out = jax.block_until_ready(out)

    ref = reference(x, wq, wk, wv, wp, bp)
    assert out.shape == (B, T, D)
    max_err = float(jnp.max(jnp.abs(out - ref)))
    assert jnp.allclose(out, ref, atol=2e-3, rtol=2e-3), (
        f"mismatch vs reference (max abs err {max_err})")

    print("KERNEL_OK")
</pallas_src>

<mosaic_0001>
module attributes {stable_mosaic.version = 11 : i64} {
  func.func @qkv_kernel(%arg0: i32, %arg1: memref<16x32xf32, #tpu.memory_space<vmem>>, %arg2: memref<32x96xf32, #tpu.memory_space<vmem>>, %arg3: memref<16x32xf32, #tpu.memory_space<vmem>>, %arg4: memref<16x32xf32, #tpu.memory_space<vmem>>, %arg5: memref<16x32xf32, #tpu.memory_space<vmem>>) attributes {dimension_semantics = [#tpu.dimension_semantics<parallel>], iteration_bounds = array<i64: 1>, scalar_prefetch = 0 : i64, scratch_operands = 0 : i64, tpu.core_type = #tpu.core_type<tc>, window_params = [{transform_indices = @transform_0, window_bounds = array<i64: 16, 32>}, {pipeline_mode = #tpu.pipeline_mode<synchronous>, transform_indices = @transform_1, window_bounds = array<i64: 32, 96>}, {transform_indices = @transform_2, window_bounds = array<i64: 16, 32>}, {transform_indices = @transform_3, window_bounds = array<i64: 16, 32>}, {transform_indices = @transform_4, window_bounds = array<i64: 16, 32>}]} {
    %c0 = arith.constant 0 : index
    %c0_0 = arith.constant 0 : index
    %0 = vector.load %arg1[%c0, %c0_0] : memref<16x32xf32, #tpu.memory_space<vmem>>, vector<16x32xf32>
    %c0_1 = arith.constant 0 : index
    %c0_2 = arith.constant 0 : index
    %1 = vector.load %arg2[%c0_1, %c0_2] : memref<32x96xf32, #tpu.memory_space<vmem>>, vector<32x96xf32>
    %cst = arith.constant dense<0.000000e+00> : vector<16x96xf32>
    %2 = tpu.matmul %0, %1, %cst {dimension_numbers = #tpu.dot_dimension_numbers<[1], [0], [0], [1], [0, 0, 1, 1], [], []>, precision = #tpu.contract_precision<fp32>} : vector<16x32xf32>, vector<32x96xf32>, vector<16x96xf32> -> vector<16x96xf32>
    %3 = vector.extract_strided_slice %2 {offsets = [0, 0], sizes = [16, 32], strides = [1, 1]} : vector<16x96xf32> to vector<16x32xf32>
    %c0_3 = arith.constant 0 : index
    %c0_4 = arith.constant 0 : index
    %4 = vector.load %arg3[%c0_3, %c0_4] : memref<16x32xf32, #tpu.memory_space<vmem>>, vector<16x32xf32>
    tpu.vector_store %arg3[%c0_3, %c0_4], %3 {strides = array<i32>} : memref<16x32xf32, #tpu.memory_space<vmem>>, vector<16x32xf32>,
    %5 = vector.extract_strided_slice %2 {offsets = [0, 32], sizes = [16, 32], strides = [1, 1]} : vector<16x96xf32> to vector<16x32xf32>
    %c0_5 = arith.constant 0 : index
    %c0_6 = arith.constant 0 : index
    %6 = vector.load %arg4[%c0_5, %c0_6] : memref<16x32xf32, #tpu.memory_space<vmem>>, vector<16x32xf32>
    tpu.vector_store %arg4[%c0_5, %c0_6], %5 {strides = array<i32>} : memref<16x32xf32, #tpu.memory_space<vmem>>, vector<16x32xf32>,
    %7 = vector.extract_strided_slice %2 {offsets = [0, 64], sizes = [16, 32], strides = [1, 1]} : vector<16x96xf32> to vector<16x32xf32>
    %c0_7 = arith.constant 0 : index
    %c0_8 = arith.constant 0 : index
    %8 = vector.load %arg5[%c0_7, %c0_8] : memref<16x32xf32, #tpu.memory_space<vmem>>, vector<16x32xf32>
    tpu.vector_store %arg5[%c0_7, %c0_8], %7 {strides = array<i32>} : memref<16x32xf32, #tpu.memory_space<vmem>>, vector<16x32xf32>,
    return
  }
  func.func @transform_0(%arg0: i32) -> (i32, i32) {
    %c0_i32 = arith.constant 0 : i32
    %c0_i32_0 = arith.constant 0 : i32
    return %arg0, %c0_i32 : i32, i32
  }
  func.func @transform_1(%arg0: i32) -> (i32, i32) {
    %c0_i32 = arith.constant 0 : i32
    %c0_i32_0 = arith.constant 0 : i32
    %c0_i32_1 = arith.constant 0 : i32
    return %c0_i32, %c0_i32_0 : i32, i32
  }
  func.func @transform_2(%arg0: i32) -> (i32, i32) {
    %c0_i32 = arith.constant 0 : i32
    %c0_i32_0 = arith.constant 0 : i32
    return %arg0, %c0_i32 : i32, i32
  }
  func.func @transform_3(%arg0: i32) -> (i32, i32) {
    %c0_i32 = arith.constant 0 : i32
    %c0_i32_0 = arith.constant 0 : i32
    return %arg0, %c0_i32 : i32, i32
  }
  func.func @transform_4(%arg0: i32) -> (i32, i32) {
    %c0_i32 = arith.constant 0 : i32
    %c0_i32_0 = arith.constant 0 : i32
    return %arg0, %c0_i32 : i32, i32
  }
}

module attributes {stable_mosaic.version = 11 : i64} {
  func.func @qkv_kernel(%arg0: i32, %arg1: memref<16x32xf32, #tpu.memory_space<vmem>>, %arg2: memref<32x96xf32, #tpu.memory_space<vmem>>, %arg3: memref<16x32xf32, #tpu.memory_space<vmem>>, %arg4: memref<16x32xf32, #tpu.memory_space<vmem>>, %arg5: memref<16x32xf32, #tpu.memory_space<vmem>>) attributes {dimension_semantics = [#tpu.dimension_semantics<parallel>], iteration_bounds = array<i64: 1>, scalar_prefetch = 0 : i64, scratch_operands = 0 : i64, tpu.core_type = #tpu.core_type<tc>, window_params = [{transform_indices = @transform_0, window_bounds = array<i64: 16, 32>}, {pipeline_mode = #tpu.pipeline_mode<synchronous>, transform_indices = @transform_1, window_bounds = array<i64: 32, 96>}, {transform_indices = @transform_2, window_bounds = array<i64: 16, 32>}, {transform_indices = @transform_3, window_bounds = array<i64: 16, 32>}, {transform_indices = @transform_4, window_bounds = array<i64: 16, 32>}]} {
    %c0 = arith.constant 0 : index
    %c0_0 = arith.constant 0 : index
    %0 = vector.load %arg1[%c0, %c0_0] : memref<16x32xf32, #tpu.memory_space<vmem>>, vector<16x32xf32>
    %c0_1 = arith.constant 0 : index
    %c0_2 = arith.constant 0 : index
    %1 = vector.load %arg2[%c0_1, %c0_2] : memref<32x96xf32, #tpu.memory_space<vmem>>, vector<32x96xf32>
    %cst = arith.constant dense<0.000000e+00> : vector<16x96xf32>
    %2 = tpu.matmul %0, %1, %cst {dimension_numbers = #tpu.dot_dimension_numbers<[1], [0], [0], [1], [0, 0, 1, 1], [], []>, precision = #tpu.contract_precision<fp32>} : vector<16x32xf32>, vector<32x96xf32>, vector<16x96xf32> -> vector<16x96xf32>
    %3 = vector.extract_strided_slice %2 {offsets = [0, 0], sizes = [16, 32], strides = [1, 1]} : vector<16x96xf32> to vector<16x32xf32>
    %c0_3 = arith.constant 0 : index
    %c0_4 = arith.constant 0 : index
    %4 = vector.load %arg3[%c0_3, %c0_4] : memref<16x32xf32, #tpu.memory_space<vmem>>, vector<16x32xf32>
    tpu.vector_store %arg3[%c0_3, %c0_4], %3 {strides = array<i32>} : memref<16x32xf32, #tpu.memory_space<vmem>>, vector<16x32xf32>,
    %5 = vector.extract_strided_slice %2 {offsets = [0, 32], sizes = [16, 32], strides = [1, 1]} : vector<16x96xf32> to vector<16x32xf32>
    %c0_5 = arith.constant 0 : index
    %c0_6 = arith.constant 0 : index
    %6 = vector.load %arg4[%c0_5, %c0_6] : memref<16x32xf32, #tpu.memory_space<vmem>>, vector<16x32xf32>
    tpu.vector_store %arg4[%c0_5, %c0_6], %5 {strides = array<i32>} : memref<16x32xf32, #tpu.memory_space<vmem>>, vector<16x32xf32>,
    %7 = vector.extract_strided_slice %2 {offsets = [0, 64], sizes = [16, 32], strides = [1, 1]} : vector<16x96xf32> to vector<16x32xf32>
    %c0_7 = arith.constant 0 : index
    %c0_8 = arith.constant 0 : index
    %8 = vector.load %arg5[%c0_7, %c0_8] : memref<16x32xf32, #tpu.memory_space<vmem>>, vector<16x32xf32>
    tpu.vector_store %arg5[%c0_7, %c0_8], %7 {strides = array<i32>} : memref<16x32xf32, #tpu.memory_space<vmem>>, vector<16x32xf32>,
    return
  }
  func.func @transform_0(%arg0: i32) -> (i32, i32) {
    %c0_i32 = arith.constant 0 : i32
    %c0_i32_0 = arith.constant 0 : i32
    return %arg0, %c0_i32 : i32, i32
  }
  func.func @transform_1(%arg0: i32) -> (i32, i32) {
    %c0_i32 = arith.constant 0 : i32
    %c0_i32_0 = arith.constant 0 : i32
    %c0_i32_1 = arith.constant 0 : i32
    return %c0_i32, %c0_i32_0 : i32, i32
  }
  func.func @transform_2(%arg0: i32) -> (i32, i32) {
    %c0_i32 = arith.constant 0 : i32
    %c0_i32_0 = arith.constant 0 : i32
    return %arg0, %c0_i32 : i32, i32
  }
  func.func @transform_3(%arg0: i32) -> (i32, i32) {
    %c0_i32 = arith.constant 0 : i32
    %c0_i32_0 = arith.constant 0 : i32
    return %arg0, %c0_i32 : i32, i32
  }
  func.func @transform_4(%arg0: i32) -> (i32, i32) {
    %c0_i32 = arith.constant 0 : i32
    %c0_i32_0 = arith.constant 0 : i32
    return %arg0, %c0_i32 : i32, i32
  }
}

</mosaic_0001>

<bundles_post_ra>
// kernel: tpu_custom_call.1
= control target key start
LH: loop header
LB: loop body
LE: loop exit
PB: predicated region body
PF: predicated region fallthrough
CT: control target
= control target key end

     0   :  { %10 = vsyncpa [#allocation3], 0  ;;  %s1077_s0 = inlined_call_operand.hbm [shape: f32[16,32], index: 0, kind: input, shape index: {}]   ;;  %s1078_s1 = inlined_call_operand.hbm [shape: f32[32,96], index: 1, kind: input, shape index: {}]   ;;  %s1079_s2 = inlined_call_operand.hbm [shape: f32[16,32], index: 2, kind: output, shape index: {0}]   ;;  %s1080_s3 = inlined_call_operand.hbm [shape: f32[16,32], index: 3, kind: output, shape index: {1}]   ;;  %s1081_s4 = inlined_call_operand.hbm [shape: f32[16,32], index: 4, kind: output, shape index: {2}]  }
   0x1   :  { %11 = vsyncpa [#allocation6], 0 }
   0x2   :  { %12 = vsyncpa [#allocation4], 0 }
   0x3   :  { %13 = vsyncpa [#allocation9], 0  ;;  %s941_s15 = smov [#allocation2]   ;;  %s823_s19 = scalar_lea.hbm %s1077_s0, 256 }
   0x4   :  { %s19_s16 = sshll.u32 %s941_s15, 4  ;;  %p824_p0 = scmp.ne.s32.totalorder %s1077_s0, %s823_s19  ;;  %s20_s16 = int_to_ptr.vmem [resolvable:$true] %s19_s16 }
   0x5   :  { %p827_p1 = scmp.lt.u32.totalorder %s823_s19, %s1077_s0 }
   0x7   :  { %p829_p2 = pnand %p827_p1, %p824_p0 }
   0x9   :  { %832 = shalt.err (!%p829_p2)
}
   0xa   :  { %s833_s24 = scalar_lea.vmem %s20_s16, 256  ;;  %p838_p4 = scmp.lt.s32.totalorder %s20_s16, %s20_s16 }
   0xb   :  { %p834_p3 = scmp.ne.s32.totalorder %s20_s16, %s833_s24  ;;  %p839_p5 = scmp.lt.s32.totalorder %s833_s24, %s833_s24 }
   0xd   :  { %p840_p6 = por %p839_p5, %p838_p4 }
   0xf   :  { %p841_p7 = pnand %p840_p6, %p834_p3 }
  0x11   :  { %844 = shalt.err (!%p841_p7)
}
  0x12   :  { %s942_s25 = smov 128   ;;  %s943_s26 = smov 8  }
  0x13   :  { %25 = dma.hbm_to_vmem [thread:$0]  %s1077_s0, 256, %s20_s16, [#allocation3], %s942_s25, %s942_s25, %s943_s26  }
  0x14   :  { %s944_s29 = smov [#allocation5]   ;;  %s845_s7 = scalar_lea.hbm %s1078_s1, 512 }
  0x15   :  { %s31_s30 = sshll.u32 %s944_s29, 4  ;;  %p846_p8 = scmp.ne.s32.totalorder %s1078_s1, %s845_s7  ;;  %s32_s30 = int_to_ptr.vmem [resolvable:$true] %s31_s30 }
  0x16   :  { %p849_p9 = scmp.lt.u32.totalorder %s845_s7, %s1078_s1 }
  0x18   :  { %p851_p10 = pnand %p849_p9, %p846_p8 }
  0x1a   :  { %854 = shalt.err (!%p851_p10)
}
  0x1b   :  { %s855_s12 = scalar_lea.vmem %s32_s30, 512  ;;  %p860_p12 = scmp.lt.s32.totalorder %s32_s30, %s32_s30 }
  0x1c   :  { %p856_p11 = scmp.ne.s32.totalorder %s32_s30, %s855_s12  ;;  %p861_p13 = scmp.lt.s32.totalorder %s855_s12, %s855_s12 }
  0x1e   :  { %p862_p0 = por %p861_p13, %p860_p12 }
  0x20   :  { %p863_p1 = pnand %p862_p0, %p856_p11 }
  0x22   :  { %866 = shalt.err (!%p863_p1)
}
  0x23   :  { %37 = dma.hbm_to_vmem [thread:$0]  %s1078_s1, 512, %s32_s30, [#allocation6], %s942_s25, %s942_s25, %s943_s26  }
  0x24   :  { %933 = dma.done.wait [#allocation3], 256  }
  0x25   :  { %934 = vsyncadd [#allocation3], 4294967040 }
  0x26   :  { %935 = dma.done.wait [#allocation6], 512  }
  0x27   :  { %936 = vsyncadd [#allocation6], 4294966784  ;;  %vm50_vm0 = vcmask 261120   ;;  %v46_v0 = vld [vmem:[#allocation5] sm:$0xff]  ;;  %v47_v1 = vld [vmem:[#allocation5 + $0x8] sm:$0xff]  ;;  %s945_s1 = smov [#allocation7]  }
  0x28   :  { %v48_v2 = vld [vmem:[#allocation5 + $0x10] sm:$0xff]  ;;  %v58_v3 = vand.u32 4294901760, %v46_v0  ;;  %v61_v4 = vand.u32 4294901760, %v47_v1  ;;  %v49_v5 = vld [vmem:[#allocation5 + $0x18] sm:$0xff]  ;;  %s610_s14 = sshll.u32 %s945_s1, 4  ;;  %s946_s15 = smov 64   ;;  %s611_s14 = int_to_ptr.vmem [resolvable:$true] %s610_s14 }
  0x29   :  { %v64_v6 = vand.u32 4294901760, %v48_v2  ;;  %v44_v7 = vld [vmem:[#allocation2] sm:$0xff]  ;;  %v45_v8 = vld [vmem:[#allocation2 + $0x8] sm:$0xff]  ;;  %v67_v9 = vand.u32 4294901760, %v49_v5  ;;  %s947_s16 = smov 96   ;;  %s867_s17 = scalar_lea.vmem %s611_s14, 256 }
  0x2a   :  { %v52_v10 = vsel %vm50_vm0, %v44_v7, 0  ;;  %v55_v11 = vsel %vm50_vm0, %v45_v8, 0  ;;  %v756_v12 = vpack.c.bf16 %v61_v4, %v58_v3  ;;  %v148_v15 = vsub.f32 %v46_v0, %v58_v3  ;;  %p868_p2 = scmp.ne.s32.totalorder %s611_s14, %s867_s17  ;;  %p872_p3 = scmp.lt.s32.totalorder %s611_s14, %s611_s14 }
  0x2b   :  { %v1007_v13 = vand.u32 4294901760, %v52_v10  ;;  %v1009_v14 = vand.u32 4294901760, %v55_v11  ;;  %v760_v16 = vpack.c.bf16 %v67_v9, %v64_v6  ;;  %v155_v17 = vsub.f32 %v47_v1, %v61_v4  ;;  %p873_p4 = scmp.lt.s32.totalorder %s867_s17, %s867_s17 }
  0x2c   :  { %v162_v18 = vsub.f32 %v48_v2, %v64_v6  ;;  %v169_v19 = vsub.f32 %v49_v5, %v67_v9  ;;  %757 = vmatprep.subr.bf16.mxu1 %v756_v12  ;;  %781 = vmatprep.subr.bf16.mxu0 %v756_v12  ;;  %v149_v22 = vand.u32 4294901760, %v148_v15 }
  0x2d   :  { %v127_v20 = vsub.f32 %v52_v10, %v1007_v13  ;;  %v137_v21 = vsub.f32 %v55_v11, %v1009_v14  ;;  %759 = vmatpush3.bf16.msra.mxu1 %v756_v12  ;;  %783 = vmatpush3.bf16.msra.mxu0 %v756_v12  ;;  %v156_v23 = vand.u32 4294901760, %v155_v17  ;;  %v772_v44 = vpack.c.bf16 %v155_v17, %v148_v15  ;;  %p874_p5 = por %p873_p4, %p872_p3 }
  0x2e   :  { %v163_v24 = vand.u32 4294901760, %v162_v18  ;;  %v170_v25 = vand.u32 4294901760, %v169_v19  ;;  %761 = vmatprep.subr.bf16.mxu1 %v760_v16  ;;  %785 = vmatprep.subr.bf16.mxu0 %v760_v16  ;;  %v150_v28 = vsub.f32 %v148_v15, %v149_v22  ;;  %v776_v45 = vpack.c.bf16 %v169_v19, %v162_v18 }
  0x2f   :  { %v128_v26 = vand.u32 4294901760, %v127_v20  ;;  %v138_v27 = vand.u32 4294901760, %v137_v21  ;;  %v157_v29 = vsub.f32 %v155_v17, %v156_v23  ;;  %v788_v30 = vpack.c.bf16 %v156_v23, %v149_v22  ;;  %p875_p6 = pnand %p874_p5, %p868_p2 }
  0x30   :  { %v164_v31 = vsub.f32 %v162_v18, %v163_v24  ;;  %v171_v32 = vsub.f32 %v169_v19, %v170_v25  ;;  %v151_v35 = vand.u32 4294901760, %v150_v28  ;;  %v792_v43 = vpack.c.bf16 %v170_v25, %v163_v24 }
  0x31   :  { %v129_v33 = vsub.f32 %v127_v20, %v128_v26  ;;  %731 = vmatprep.mubr.f32.mxu0 %v128_v26  ;;  %v139_v34 = vsub.f32 %v137_v21, %v138_v27  ;;  %763 = vmatpush3.bf16.msra.mxu1 %v760_v16  ;;  %v158_v36 = vand.u32 4294901760, %v157_v29 }
  0x32   :  { %787 = vmatpush3.bf16.msra.mxu0 %v760_v16  ;;  %v165_v37 = vand.u32 4294901760, %v164_v31  ;;  %v172_v38 = vand.u32 4294901760, %v171_v32 }
  0x33   :  { %v130_v39 = vand.u32 4294901760, %v129_v33  ;;  %v140_v40 = vand.u32 4294901760, %v139_v34  ;;  %789 = vmatprep.subr.bf16.mxu0 %v788_v30  ;;  %v764_v41 = vpack.c.bf16 %v158_v36, %v151_v35 }
  0x34   :  { %v768_v42 = vpack.c.bf16 %v172_v38, %v165_v37 }
  0x35   :  { %698 = vmatprep.mubr.f32.mxu1 %v130_v39  ;;  %732 = vmatmul.mubr.f32.vlgmr.msra.gmra.mrb[0].mxu0 %v138_v27 }
  0x36   :  { %699 = vmatmul.mubr.f32.vlgmr.msra.gmra.mrb[0].mxu1 %v140_v40  ;;  %765 = vmatprep.subr.bf16.mxu1 %v764_v41 }
  0x37   :  { %767 = vmatpush3.bf16.msra.mxu1 %v764_v41  ;;  %791 = vmatpush3.bf16.msra.mxu0 %v788_v30 }
  0x38   :  { %769 = vmatprep.subr.bf16.mxu1 %v768_v42  ;;  %793 = vmatprep.subr.bf16.mxu0 %v792_v43 }
  0x39   :  { %709 = vmatprep.mubr.f32.mxu1 %v1007_v13  ;;  %742 = vmatprep.mubr.f32.mxu0 %v1007_v13 }
  0x3b   :  { %771 = vmatpush3.bf16.msra.mxu1 %v768_v42  ;;  %795 = vmatpush3.bf16.msra.mxu0 %v792_v43 }
  0x3c   :  { %773 = vmatprep.subr.bf16.mxu1 %v772_v44  ;;  %797 = vmatprep.subr.bf16.mxu0 %v756_v12 }
  0x3e   :  { %710 = vmatmul.mubr.f32.vlgmr.msra.gmra.mrb[0].mxu1 %v1009_v14  ;;  %743 = vmatmul.mubr.f32.vlgmr.msra.gmra.mrb[0].mxu0 %v1009_v14 }
  0x3f   :  { %775 = vmatpush3.bf16.msra.mxu1 %v772_v44  ;;  %799 = vmatpush3.bf16.msra.mxu0 %v756_v12 }
  0x40   :  { %777 = vmatprep.subr.bf16.mxu1 %v776_v45  ;;  %801 = vmatprep.subr.bf16.mxu0 %v760_v16 }
  0x41   :  { %720 = vmatprep.mubr.f32.mxu1 %v127_v20  ;;  %753 = vmatprep.mubr.f32.mxu0 %v1007_v13 }
  0x43   :  { %779 = vmatpush3.bf16.msra.mxu1 %v776_v45  ;;  %803 = vmatpush3.bf16.msra.mxu0 %v760_v16 }
  0x46   :  { %721 = vmatmul.mubr.f32.vlgmr.msra.gmra.mrb[0].mxu1 %v137_v21  ;;  %754 = vmatmul.mubr.f32.vlgmr.msra.gmra.mrb[0].mxu0 %v1009_v14 }
 0x119   :  { %v722_v46 = vpop.f32.mrb[0].mxu1  ;;  %v755_v47 = vpop.f32.mrb[0].mxu0 }
 0x11a   :  { %v804_v48 = vadd.f32 %v755_v47, %v722_v46  ;;  %v319_v49 = vpop.f32.mrb[1].mxu1  ;;  %v575_v50 = vpop.f32.mrb[1].mxu0 }
 0x11b   :  { %v805_v51 = vadd.f32 %v575_v50, %v319_v49 }
 0x11c   :  { %586 = vst.msk [vmem:[#allocation7 + $0x8] sm:$0xff] %vm50_vm0, %v804_v48 }
 0x11d   :  { %585 = vst.msk [vmem:[#allocation7] sm:$0xff] %vm50_vm0, %v805_v51  ;;  %597 = vrot.lane.b32.xlu1 %v805_v51, %s946_s15  ;;  %589 = vrot.lane.b32.xlu0 %v805_v51, %s947_s16 }
 0x11e   :  { %878 = shalt.err (!%p875_p6)
}
 0x11f   :  { %s879_s20 = scalar_lea.hbm %s1079_s2, 256 }
 0x120   :  { %p880_p7 = scmp.ne.s32.totalorder %s1079_s2, %s879_s20  ;;  %p883_p8 = scmp.lt.u32.totalorder %s879_s20, %s1079_s2 }
 0x122   :  { %p885_p9 = pnand %p883_p8, %p880_p7 }
 0x124   :  { %888 = shalt.err (!%p885_p9)
}
 0x125   :  { %616 = dma.vmem_to_hbm [thread:$0]  %s611_s14, 256, %s1079_s2, [#allocation4], %s942_s25, %s942_s25, %s943_s26  }
 0x126   :  { %599 = vrot.lane.b32.xlu1 %v804_v48, %s946_s15  ;;  %591 = vrot.lane.b32.xlu0 %v804_v48, %s947_s16  ;;  %s948_s29 = smov [#allocation8]   ;;  %s949_s5 = smov [#allocation10]  }
 0x127   :  { %s622_s30 = sshll.u32 %s948_s29, 4  ;;  %s634_s6 = sshll.u32 %s949_s5, 4  ;;  %s623_s30 = int_to_ptr.vmem [resolvable:$true] %s622_s30  ;;  %s1038_s6 = int_to_ptr.vmem [resolvable:$true] %s634_s6 }
 0x128   :  { %s889_s2 = scalar_lea.vmem %s623_s30, 256  ;;  %p894_p11 = scmp.lt.s32.totalorder %s623_s30, %s623_s30 }
 0x129   :  { %p890_p10 = scmp.ne.s32.totalorder %s623_s30, %s889_s2  ;;  %p895_p12 = scmp.lt.s32.totalorder %s889_s2, %s889_s2 }
 0x12b   :  { %p896_p13 = por %p895_p12, %p894_p11 }
 0x12d   :  { %p897_p0 = pnand %p896_p13, %p890_p10 }
 0x18f   :  { %v598_v52 = vpop.permute.xlu1 %597  ;;  %v590_v53 = vpop.permute.xlu0 %589 }
 0x190   :  { %603 = vst.msk [vmem:[#allocation10] sm:$0xff] %vm50_vm0, %v598_v52  ;;  %595 = vst.msk [vmem:[#allocation8] sm:$0xff] %vm50_vm0, %v590_v53 }
 0x198   :  { %v600_v54 = vpop.permute.xlu1 %599  ;;  %v592_v55 = vpop.permute.xlu0 %591 }
 0x199   :  { %604 = vst.msk [vmem:[#allocation10 + $0x8] sm:$0xff] %vm50_vm0, %v600_v54  ;;  %596 = vst.msk [vmem:[#allocation8 + $0x8] sm:$0xff] %vm50_vm0, %v592_v55 }
 0x19a   :  { %900 = shalt.err (!%p897_p0)
}
 0x19b   :  { %s901_s9 = scalar_lea.hbm %s1080_s3, 256 }
 0x19c   :  { %p902_p1 = scmp.ne.s32.totalorder %s1080_s3, %s901_s9  ;;  %p905_p2 = scmp.lt.u32.totalorder %s901_s9, %s1080_s3 }
 0x19e   :  { %p907_p3 = pnand %p905_p2, %p902_p1 }
 0x1a0   :  { %910 = shalt.err (!%p907_p3)
}
 0x1a1   :  { %628 = dma.vmem_to_hbm [thread:$0]  %s623_s30, 256, %s1080_s3, [#allocation9], %s942_s25, %s942_s25, %s943_s26  }
 0x1a2   :  { %s911_s14 = scalar_lea.vmem %s1038_s6, 256  ;;  %p916_p5 = scmp.lt.s32.totalorder %s1038_s6, %s1038_s6 }
 0x1a3   :  { %p912_p4 = scmp.ne.s32.totalorder %s1038_s6, %s911_s14  ;;  %p917_p6 = scmp.lt.s32.totalorder %s911_s14, %s911_s14 }
 0x1a5   :  { %p918_p7 = por %p917_p6, %p916_p5 }
 0x1a7   :  { %p919_p8 = pnand %p918_p7, %p912_p4 }
 0x1a9   :  { %922 = shalt.err (!%p919_p8)
}
 0x1aa   :  { %s923_s17 = scalar_lea.hbm %s1081_s4, 256 }
 0x1ab   :  { %p924_p9 = scmp.ne.s32.totalorder %s1081_s4, %s923_s17  ;;  %p927_p10 = scmp.lt.u32.totalorder %s923_s17, %s1081_s4 }
 0x1ad   :  { %p929_p11 = pnand %p927_p10, %p924_p9 }
 0x1af   :  { %932 = shalt.err (!%p929_p11)
}
 0x1b0   :  { %640 = dma.vmem_to_hbm [thread:$0]  %s1038_s6, 256, %s1081_s4, [#allocation9], %s942_s25, %s942_s25, %s943_s26  }
 0x1b1   :  { %937 = dma.done.wait [#allocation4], 256  }
 0x1b2   :  { %938 = vsyncadd [#allocation4], 4294967040 }
 0x1b3   :  { %939 = dma.done.wait [#allocation9], 512  }
 0x1b4   :  { %940 = vsyncadd [#allocation9], 4294966784 }
 0x1b5   :  { %650 = vsyncpa [#allocation3], 1 }
 0x1b6   :  { %651 = vsyncpa [#allocation6], 1 }
 0x1b7   :  { %652 = vsyncpa [#allocation4], 1 }
 0x1b8   :  { %653 = vsyncpa [#allocation9], 1 }

// kernel: tpu_custom_call.1
= control target key start
LH: loop header
LB: loop body
LE: loop exit
PB: predicated region body
PF: predicated region fallthrough
CT: control target
= control target key end

     0   :  { %10 = vsyncpa [#allocation3], 0  ;;  %s1077_s0 = inlined_call_operand.hbm [shape: f32[16,32], index: 0, kind: input, shape index: {}]   ;;  %s1078_s1 = inlined_call_operand.hbm [shape: f32[32,96], index: 1, kind: input, shape index: {}]   ;;  %s1079_s2 = inlined_call_operand.hbm [shape: f32[16,32], index: 2, kind: output, shape index: {0}]   ;;  %s1080_s3 = inlined_call_operand.hbm [shape: f32[16,32], index: 3, kind: output, shape index: {1}]   ;;  %s1081_s4 = inlined_call_operand.hbm [shape: f32[16,32], index: 4, kind: output, shape index: {2}]  }
   0x1   :  { %11 = vsyncpa [#allocation6], 0 }
   0x2   :  { %12 = vsyncpa [#allocation4], 0 }
   0x3   :  { %13 = vsyncpa [#allocation9], 0  ;;  %s941_s15 = smov [#allocation2]   ;;  %s823_s19 = scalar_lea.hbm %s1077_s0, 256 }
   0x4   :  { %s19_s16 = sshll.u32 %s941_s15, 4  ;;  %p824_p0 = scmp.ne.s32.totalorder %s1077_s0, %s823_s19  ;;  %s20_s16 = int_to_ptr.vmem [resolvable:$true] %s19_s16 }
   0x5   :  { %p827_p1 = scmp.lt.u32.totalorder %s823_s19, %s1077_s0 }
   0x7   :  { %p829_p2 = pnand %p827_p1, %p824_p0 }
   0x9   :  { %832 = shalt.err (!%p829_p2)
}
   0xa   :  { %s833_s24 = scalar_lea.vmem %s20_s16, 256  ;;  %p838_p4 = scmp.lt.s32.totalorder %s20_s16, %s20_s16 }
   0xb   :  { %p834_p3 = scmp.ne.s32.totalorder %s20_s16, %s833_s24  ;;  %p839_p5 = scmp.lt.s32.totalorder %s833_s24, %s833_s24 }
   0xd   :  { %p840_p6 = por %p839_p5, %p838_p4 }
   0xf   :  { %p841_p7 = pnand %p840_p6, %p834_p3 }
  0x11   :  { %844 = shalt.err (!%p841_p7)
}
  0x12   :  { %s942_s25 = smov 128   ;;  %s943_s26 = smov 8  }
  0x13   :  { %25 = dma.hbm_to_vmem [thread:$0]  %s1077_s0, 256, %s20_s16, [#allocation3], %s942_s25, %s942_s25, %s943_s26  }
  0x14   :  { %s944_s29 = smov [#allocation5]   ;;  %s845_s7 = scalar_lea.hbm %s1078_s1, 512 }
  0x15   :  { %s31_s30 = sshll.u32 %s944_s29, 4  ;;  %p846_p8 = scmp.ne.s32.totalorder %s1078_s1, %s845_s7  ;;  %s32_s30 = int_to_ptr.vmem [resolvable:$true] %s31_s30 }
  0x16   :  { %p849_p9 = scmp.lt.u32.totalorder %s845_s7, %s1078_s1 }
  0x18   :  { %p851_p10 = pnand %p849_p9, %p846_p8 }
  0x1a   :  { %854 = shalt.err (!%p851_p10)
}
  0x1b   :  { %s855_s12 = scalar_lea.vmem %s32_s30, 512  ;;  %p860_p12 = scmp.lt.s32.totalorder %s32_s30, %s32_s30 }
  0x1c   :  { %p856_p11 = scmp.ne.s32.totalorder %s32_s30, %s855_s12  ;;  %p861_p13 = scmp.lt.s32.totalorder %s855_s12, %s855_s12 }
  0x1e   :  { %p862_p0 = por %p861_p13, %p860_p12 }
  0x20   :  { %p863_p1 = pnand %p862_p0, %p856_p11 }
  0x22   :  { %866 = shalt.err (!%p863_p1)
}
  0x23   :  { %37 = dma.hbm_to_vmem [thread:$0]  %s1078_s1, 512, %s32_s30, [#allocation6], %s942_s25, %s942_s25, %s943_s26  }
  0x24   :  { %933 = dma.done.wait [#allocation3], 256  }
  0x25   :  { %934 = vsyncadd [#allocation3], 4294967040 }
  0x26   :  { %935 = dma.done.wait [#allocation6], 512  }
  0x27   :  { %936 = vsyncadd [#allocation6], 4294966784  ;;  %vm50_vm0 = vcmask 261120   ;;  %v46_v0 = vld [vmem:[#allocation5] sm:$0xff]  ;;  %v47_v1 = vld [vmem:[#allocation5 + $0x8] sm:$0xff]  ;;  %s945_s1 = smov [#allocation7]  }
  0x28   :  { %v48_v2 = vld [vmem:[#allocation5 + $0x10] sm:$0xff]  ;;  %v58_v3 = vand.u32 4294901760, %v46_v0  ;;  %v61_v4 = vand.u32 4294901760, %v47_v1  ;;  %v49_v5 = vld [vmem:[#allocation5 + $0x18] sm:$0xff]  ;;  %s610_s14 = sshll.u32 %s945_s1, 4  ;;  %s946_s15 = smov 64   ;;  %s611_s14 = int_to_ptr.vmem [resolvable:$true] %s610_s14 }
  0x29   :  { %v64_v6 = vand.u32 4294901760, %v48_v2  ;;  %v44_v7 = vld [vmem:[#allocation2] sm:$0xff]  ;;  %v45_v8 = vld [vmem:[#allocation2 + $0x8] sm:$0xff]  ;;  %v67_v9 = vand.u32 4294901760, %v49_v5  ;;  %s947_s16 = smov 96   ;;  %s867_s17 = scalar_lea.vmem %s611_s14, 256 }
  0x2a   :  { %v52_v10 = vsel %vm50_vm0, %v44_v7, 0  ;;  %v55_v11 = vsel %vm50_vm0, %v45_v8, 0  ;;  %v756_v12 = vpack.c.bf16 %v61_v4, %v58_v3  ;;  %v148_v15 = vsub.f32 %v46_v0, %v58_v3  ;;  %p868_p2 = scmp.ne.s32.totalorder %s611_s14, %s867_s17  ;;  %p872_p3 = scmp.lt.s32.totalorder %s611_s14, %s611_s14 }
  0x2b   :  { %v1007_v13 = vand.u32 4294901760, %v52_v10  ;;  %v1009_v14 = vand.u32 4294901760, %v55_v11  ;;  %v760_v16 = vpack.c.bf16 %v67_v9, %v64_v6  ;;  %v155_v17 = vsub.f32 %v47_v1, %v61_v4  ;;  %p873_p4 = scmp.lt.s32.totalorder %s867_s17, %s867_s17 }
  0x2c   :  { %v162_v18 = vsub.f32 %v48_v2, %v64_v6  ;;  %v169_v19 = vsub.f32 %v49_v5, %v67_v9  ;;  %757 = vmatprep.subr.bf16.mxu1 %v756_v12  ;;  %781 = vmatprep.subr.bf16.mxu0 %v756_v12  ;;  %v149_v22 = vand.u32 4294901760, %v148_v15 }
  0x2d   :  { %v127_v20 = vsub.f32 %v52_v10, %v1007_v13  ;;  %v137_v21 = vsub.f32 %v55_v11, %v1009_v14  ;;  %759 = vmatpush3.bf16.msra.mxu1 %v756_v12  ;;  %783 = vmatpush3.bf16.msra.mxu0 %v756_v12  ;;  %v156_v23 = vand.u32 4294901760, %v155_v17  ;;  %v772_v44 = vpack.c.bf16 %v155_v17, %v148_v15  ;;  %p874_p5 = por %p873_p4, %p872_p3 }
  0x2e   :  { %v163_v24 = vand.u32 4294901760, %v162_v18  ;;  %v170_v25 = vand.u32 4294901760, %v169_v19  ;;  %761 = vmatprep.subr.bf16.mxu1 %v760_v16  ;;  %785 = vmatprep.subr.bf16.mxu0 %v760_v16  ;;  %v150_v28 = vsub.f32 %v148_v15, %v149_v22  ;;  %v776_v45 = vpack.c.bf16 %v169_v19, %v162_v18 }
  0x2f   :  { %v128_v26 = vand.u32 4294901760, %v127_v20  ;;  %v138_v27 = vand.u32 4294901760, %v137_v21  ;;  %v157_v29 = vsub.f32 %v155_v17, %v156_v23  ;;  %v788_v30 = vpack.c.bf16 %v156_v23, %v149_v22  ;;  %p875_p6 = pnand %p874_p5, %p868_p2 }
  0x30   :  { %v164_v31 = vsub.f32 %v162_v18, %v163_v24  ;;  %v171_v32 = vsub.f32 %v169_v19, %v170_v25  ;;  %v151_v35 = vand.u32 4294901760, %v150_v28  ;;  %v792_v43 = vpack.c.bf16 %v170_v25, %v163_v24 }
  0x31   :  { %v129_v33 = vsub.f32 %v127_v20, %v128_v26  ;;  %731 = vmatprep.mubr.f32.mxu0 %v128_v26  ;;  %v139_v34 = vsub.f32 %v137_v21, %v138_v27  ;;  %763 = vmatpush3.bf16.msra.mxu1 %v760_v16  ;;  %v158_v36 = vand.u32 4294901760, %v157_v29 }
  0x32   :  { %787 = vmatpush3.bf16.msra.mxu0 %v760_v16  ;;  %v165_v37 = vand.u32 4294901760, %v164_v31  ;;  %v172_v38 = vand.u32 4294901760, %v171_v32 }
  0x33   :  { %v130_v39 = vand.u32 4294901760, %v129_v33  ;;  %v140_v40 = vand.u32 4294901760, %v139_v34  ;;  %789 = vmatprep.subr.bf16.mxu0 %v788_v30  ;;  %v764_v41 = vpack.c.bf16 %v158_v36, %v151_v35 }
  0x34   :  { %v768_v42 = vpack.c.bf16 %v172_v38, %v165_v37 }
  0x35   :  { %698 = vmatprep.mubr.f32.mxu1 %v130_v39  ;;  %732 = vmatmul.mubr.f32.vlgmr.msra.gmra.mrb[0].mxu0 %v138_v27 }
  0x36   :  { %699 = vmatmul.mubr.f32.vlgmr.msra.gmra.mrb[0].mxu1 %v140_v40  ;;  %765 = vmatprep.subr.bf16.mxu1 %v764_v41 }
  0x37   :  { %767 = vmatpush3.bf16.msra.mxu1 %v764_v41  ;;  %791 = vmatpush3.bf16.msra.mxu0 %v788_v30 }
  0x38   :  { %769 = vmatprep.subr.bf16.mxu1 %v768_v42  ;;  %793 = vmatprep.subr.bf16.mxu0 %v792_v43 }
  0x39   :  { %709 = vmatprep.mubr.f32.mxu1 %v1007_v13  ;;  %742 = vmatprep.mubr.f32.mxu0 %v1007_v13 }
  0x3b   :  { %771 = vmatpush3.bf16.msra.mxu1 %v768_v42  ;;  %795 = vmatpush3.bf16.msra.mxu0 %v792_v43 }
  0x3c   :  { %773 = vmatprep.subr.bf16.mxu1 %v772_v44  ;;  %797 = vmatprep.subr.bf16.mxu0 %v756_v12 }
  0x3e   :  { %710 = vmatmul.mubr.f32.vlgmr.msra.gmra.mrb[0].mxu1 %v1009_v14  ;;  %743 = vmatmul.mubr.f32.vlgmr.msra.gmra.mrb[0].mxu0 %v1009_v14 }
  0x3f   :  { %775 = vmatpush3.bf16.msra.mxu1 %v772_v44  ;;  %799 = vmatpush3.bf16.msra.mxu0 %v756_v12 }
  0x40   :  { %777 = vmatprep.subr.bf16.mxu1 %v776_v45  ;;  %801 = vmatprep.subr.bf16.mxu0 %v760_v16 }
  0x41   :  { %720 = vmatprep.mubr.f32.mxu1 %v127_v20  ;;  %753 = vmatprep.mubr.f32.mxu0 %v1007_v13 }
  0x43   :  { %779 = vmatpush3.bf16.msra.mxu1 %v776_v45  ;;  %803 = vmatpush3.bf16.msra.mxu0 %v760_v16 }
  0x46   :  { %721 = vmatmul.mubr.f32.vlgmr.msra.gmra.mrb[0].mxu1 %v137_v21  ;;  %754 = vmatmul.mubr.f32.vlgmr.msra.gmra.mrb[0].mxu0 %v1009_v14 }
 0x119   :  { %v722_v46 = vpop.f32.mrb[0].mxu1  ;;  %v755_v47 = vpop.f32.mrb[0].mxu0 }
 0x11a   :  { %v804_v48 = vadd.f32 %v755_v47, %v722_v46  ;;  %v319_v49 = vpop.f32.mrb[1].mxu1  ;;  %v575_v50 = vpop.f32.mrb[1].mxu0 }
 0x11b   :  { %v805_v51 = vadd.f32 %v575_v50, %v319_v49 }
 0x11c   :  { %586 = vst.msk [vmem:[#allocation7 + $0x8] sm:$0xff] %vm50_vm0, %v804_v48 }
 0x11d   :  { %585 = vst.msk [vmem:[#allocation7] sm:$0xff] %vm50_vm0, %v805_v51  ;;  %597 = vrot.lane.b32.xlu1 %v805_v51, %s946_s15  ;;  %589 = vrot.lane.b32.xlu0 %v805_v51, %s947_s16 }
 0x11e   :  { %878 = shalt.err (!%p875_p6)
}
 0x11f   :  { %s879_s20 = scalar_lea.hbm %s1079_s2, 256 }
 0x120   :  { %p880_p7 = scmp.ne.s32.totalorder %s1079_s2, %s879_s20  ;;  %p883_p8 = scmp.lt.u32.totalorder %s879_s20, %s1079_s2 }
 0x122   :  { %p885_p9 = pnand %p883_p8, %p880_p7 }
 0x124   :  { %888 = shalt.err (!%p885_p9)
}
 0x125   :  { %616 = dma.vmem_to_hbm [thread:$0]  %s611_s14, 256, %s1079_s2, [#allocation4], %s942_s25, %s942_s25, %s943_s26  }
 0x126   :  { %599 = vrot.lane.b32.xlu1 %v804_v48, %s946_s15  ;;  %591 = vrot.lane.b32.xlu0 %v804_v48, %s947_s16  ;;  %s948_s29 = smov [#allocation8]   ;;  %s949_s5 = smov [#allocation10]  }
 0x127   :  { %s622_s30 = sshll.u32 %s948_s29, 4  ;;  %s634_s6 = sshll.u32 %s949_s5, 4  ;;  %s623_s30 = int_to_ptr.vmem [resolvable:$true] %s622_s30  ;;  %s1038_s6 = int_to_ptr.vmem [resolvable:$true] %s634_s6 }
 0x128   :  { %s889_s2 = scalar_lea.vmem %s623_s30, 256  ;;  %p894_p11 = scmp.lt.s32.totalorder %s623_s30, %s623_s30 }
 0x129   :  { %p890_p10 = scmp.ne.s32.totalorder %s623_s30, %s889_s2  ;;  %p895_p12 = scmp.lt.s32.totalorder %s889_s2, %s889_s2 }
 0x12b   :  { %p896_p13 = por %p895_p12, %p894_p11 }
 0x12d   :  { %p897_p0 = pnand %p896_p13, %p890_p10 }
 0x18f   :  { %v598_v52 = vpop.permute.xlu1 %597  ;;  %v590_v53 = vpop.permute.xlu0 %589 }
 0x190   :  { %603 = vst.msk [vmem:[#allocation10] sm:$0xff] %vm50_vm0, %v598_v52  ;;  %595 = vst.msk [vmem:[#allocation8] sm:$0xff] %vm50_vm0, %v590_v53 }
 0x198   :  { %v600_v54 = vpop.permute.xlu1 %599  ;;  %v592_v55 = vpop.permute.xlu0 %591 }
 0x199   :  { %604 = vst.msk [vmem:[#allocation10 + $0x8] sm:$0xff] %vm50_vm0, %v600_v54  ;;  %596 = vst.msk [vmem:[#allocation8 + $0x8] sm:$0xff] %vm50_vm0, %v592_v55 }
 0x19a   :  { %900 = shalt.err (!%p897_p0)
}
 0x19b   :  { %s901_s9 = scalar_lea.hbm %s1080_s3, 256 }
 0x19c   :  { %p902_p1 = scmp.ne.s32.totalorder %s1080_s3, %s901_s9  ;;  %p905_p2 = scmp.lt.u32.totalorder %s901_s9, %s1080_s3 }
 0x19e   :  { %p907_p3 = pnand %p905_p2, %p902_p1 }
 0x1a0   :  { %910 = shalt.err (!%p907_p3)
}
 0x1a1   :  { %628 = dma.vmem_to_hbm [thread:$0]  %s623_s30, 256, %s1080_s3, [#allocation9], %s942_s25, %s942_s25, %s943_s26  }
 0x1a2   :  { %s911_s14 = scalar_lea.vmem %s1038_s6, 256  ;;  %p916_p5 = scmp.lt.s32.totalorder %s1038_s6, %s1038_s6 }
 0x1a3   :  { %p912_p4 = scmp.ne.s32.totalorder %s1038_s6, %s911_s14  ;;  %p917_p6 = scmp.lt.s32.totalorder %s911_s14, %s911_s14 }
 0x1a5   :  { %p918_p7 = por %p917_p6, %p916_p5 }
 0x1a7   :  { %p919_p8 = pnand %p918_p7, %p912_p4 }
 0x1a9   :  { %922 = shalt.err (!%p919_p8)
}
 0x1aa   :  { %s923_s17 = scalar_lea.hbm %s1081_s4, 256 }
 0x1ab   :  { %p924_p9 = scmp.ne.s32.totalorder %s1081_s4, %s923_s17  ;;  %p927_p10 = scmp.lt.u32.totalorder %s923_s17, %s1081_s4 }
 0x1ad   :  { %p929_p11 = pnand %p927_p10, %p924_p9 }
 0x1af   :  { %932 = shalt.err (!%p929_p11)
}
 0x1b0   :  { %640 = dma.vmem_to_hbm [thread:$0]  %s1038_s6, 256, %s1081_s4, [#allocation9], %s942_s25, %s942_s25, %s943_s26  }
 0x1b1   :  { %937 = dma.done.wait [#allocation4], 256  }
 0x1b2   :  { %938 = vsyncadd [#allocation4], 4294967040 }
 0x1b3   :  { %939 = dma.done.wait [#allocation9], 512  }
 0x1b4   :  { %940 = vsyncadd [#allocation9], 4294966784 }
 0x1b5   :  { %650 = vsyncpa [#allocation3], 1 }
 0x1b6   :  { %651 = vsyncpa [#allocation6], 1 }
 0x1b7   :  { %652 = vsyncpa [#allocation4], 1 }
 0x1b8   :  { %653 = vsyncpa [#allocation9], 1 }

</bundles_post_ra>
